<compile_context>
chip_gen: v7x
topology: tpu7x:2x2x1
jax: 0.10.0
libtpu: 0.0.40
codegen_flags: <defaults>
</compile_context>

<pallas_src>
import functools

import jax
import jax.numpy as jnp
from jax.experimental import pallas as pl
from jax.experimental.pallas import tpu as pltpu

IN_DIM = 2
HIDDEN = 50
LATENT_DIM = 6

# packed layouts
_W_IN_ROWS = IN_DIM + LATENT_DIM                  # 8  : [We1^T(2,50); Wd1^T(6,50)]
_W_OUT_COLS = 2 * LATENT_DIM + IN_DIM             # 14 : [Wmu^T | Wstd^T | Wd3^T]
_BIAS_LEN = 3 * HIDDEN + 2 * LATENT_DIM + 2 * HIDDEN + IN_DIM   # 264
_OUT_COLS = HIDDEN + 3 * LATENT_DIM + IN_DIM      # 70 useful columns
_OUT_SLAB = 128                                   # lane-dense output width

# bias offsets inside the packed (1, 264) row
_OFF_BE1 = 0
_OFF_BE2 = _OFF_BE1 + HIDDEN          # 50
_OFF_BE3 = _OFF_BE2 + HIDDEN          # 100
_OFF_BHEAD = _OFF_BE3 + HIDDEN        # 150  ([bmu | bstd], 12 wide)
_OFF_BD1 = _OFF_BHEAD + 2 * LATENT_DIM  # 162
_OFF_BD2 = _OFF_BD1 + HIDDEN          # 212
_OFF_BD3 = _OFF_BD2 + HIDDEN          # 262


def _vae_kernel(x_ref, eps_ref, wbig_ref, win_ref, wout_ref, b_ref, out_ref):
    f32 = jnp.float32
    x = x_ref[...]                                   # (bn, 2)

    # ---- packed biases (static lane slices of the (1,264) row) ------------
    be1 = b_ref[:, _OFF_BE1:_OFF_BE1 + HIDDEN]
    be2 = b_ref[:, _OFF_BE2:_OFF_BE2 + HIDDEN]
    be3 = b_ref[:, _OFF_BE3:_OFF_BE3 + HIDDEN]
    bhead = b_ref[:, _OFF_BHEAD:_OFF_BHEAD + 2 * LATENT_DIM]
    bd1 = b_ref[:, _OFF_BD1:_OFF_BD1 + HIDDEN]
    bd2 = b_ref[:, _OFF_BD2:_OFF_BD2 + HIDDEN]
    bd3 = b_ref[:, _OFF_BD3:_OFF_BD3 + IN_DIM]

    # ---- Encoder layer 1 (K=2): VPU broadcast FMAs, skip the MXU ----------
    w_x0 = win_ref[0:1, :]                           # (1,50) weights for x[:,0]
    w_x1 = win_ref[1:2, :]                           # (1,50) weights for x[:,1]
    h = x[:, 0:1] * w_x0 + x[:, 1:2] * w_x1 + be1
    h = jnp.maximum(h, 0.0)

    # ---- Encoder layers 2,3 (50x50) on the MXU -----------------------------
    h = jnp.dot(h, wbig_ref[0], preferred_element_type=f32) + be2
    h = jnp.maximum(h, 0.0)
    h = jnp.dot(h, wbig_ref[1], preferred_element_type=f32) + be3
    y = jnp.maximum(h, 0.0)

    # ---- Fused mu / logstd^2 heads: one (50 x 12) matmul -------------------
    head = jnp.dot(y, wout_ref[:, 0:2 * LATENT_DIM],
                   preferred_element_type=f32) + bhead
    mean = head[:, 0:LATENT_DIM]
    stddev_p = head[:, LATENT_DIM:2 * LATENT_DIM]

    # ---- Reparameterization: z = eps * exp(stddev_p / 2) + mean ------------
    z = eps_ref[...] * jnp.exp(stddev_p * 0.5) + mean

    # ---- Decoder: 6 -> 50 -> ReLU -> 50 -> ReLU -> 2 -> Sigmoid -------------
    d = jnp.dot(z, win_ref[IN_DIM:_W_IN_ROWS, :],
                preferred_element_type=f32) + bd1
    d = jnp.maximum(d, 0.0)
    d = jnp.dot(d, wbig_ref[2], preferred_element_type=f32) + bd2
    d = jnp.maximum(d, 0.0)
    d = jnp.dot(d, wout_ref[:, 2 * LATENT_DIM:_W_OUT_COLS],
                preferred_element_type=f32) + bd3
    xhat = jax.nn.sigmoid(d)

    # ---- Single lane-dense output slab [y|mean|stddev|z|xhat|pad] ----------
    bn = out_ref.shape[0]
    pad = jnp.zeros((bn, _OUT_SLAB - _OUT_COLS), f32)
    out_ref[...] = jnp.concatenate([y, mean, stddev_p, z, xhat, pad], axis=-1)


def prepare_params(params):
    """Pack PyTorch-convention params ONCE into the kernel's packed layout.

    Weights come in as (out, in); we transpose to (in, out) so the kernel
    computes `h = x @ W + b` directly, then pack into 4 arrays.
    """
    T = lambda k: jnp.asarray(params[k], jnp.float32).T
    v = lambda k: jnp.asarray(params[k], jnp.float32)

    w_big = jnp.stack([T("We2"), T("We3"), T("Wd2")])              # (3,50,50)
    w_in = jnp.concatenate([T("We1"), T("Wd1")], axis=0)           # (8,50)
    w_out = jnp.concatenate([T("Wmu"), T("Wstd"), T("Wd3")], axis=1)  # (50,14)
    biases = jnp.concatenate(
        [v("be1"), v("be2"), v("be3"), v("bmu"), v("bstd"),
         v("bd1"), v("bd2"), v("bd3")])[None, :]                   # (1,264)
    return {"w_big": w_big, "w_in": w_in, "w_out": w_out, "biases": biases}


def _block_rows(n):
    """Batch row-tile: 256 for large batches, else N rounded up to 8."""
    if n >= 256:
        return 256
    return ((n + 7) // 8) * 8


@jax.jit
def vae_forward(x, eps, packed):
    """Runs the VAE forward pass.

    x:      (N, 2) float32
    eps:    (N, latent_dim) float32 standard-normal draws (torch.randn analogue)
    packed: output of prepare_params()
    Returns (y, mean, stddev_p, z, xhat) matching VAE.forward().
    """
    n = x.shape[0]
    bn = _block_rows(n)
    n_pad = ((n + bn - 1) // bn) * bn

    x_p = jnp.zeros((n_pad, IN_DIM), jnp.float32).at[:n].set(
        x.astype(jnp.float32))
    eps_p = jnp.zeros((n_pad, LATENT_DIM), jnp.float32).at[:n].set(
        eps.astype(jnp.float32))

    slab = pl.pallas_call(
        _vae_kernel,
        out_shape=jax.ShapeDtypeStruct((n_pad, _OUT_SLAB), jnp.float32),
        grid=(n_pad // bn,),
        in_specs=[
            pl.BlockSpec((bn, IN_DIM), lambda i: (i, 0)),
            pl.BlockSpec((bn, LATENT_DIM), lambda i: (i, 0)),
            pl.BlockSpec((3, HIDDEN, HIDDEN), lambda i: (0, 0, 0)),
            pl.BlockSpec((_W_IN_ROWS, HIDDEN), lambda i: (0, 0)),
            pl.BlockSpec((HIDDEN, _W_OUT_COLS), lambda i: (0, 0)),
            pl.BlockSpec((1, _BIAS_LEN), lambda i: (0, 0)),
        ],
        out_specs=pl.BlockSpec((bn, _OUT_SLAB), lambda i: (i, 0)),
        compiler_params=pltpu.CompilerParams(
            dimension_semantics=("parallel",)),
    )(x_p, eps_p, packed["w_big"], packed["w_in"], packed["w_out"],
      packed["biases"])

    slab = slab[:n]
    y = slab[:, 0:HIDDEN]
    mean = slab[:, HIDDEN:HIDDEN + LATENT_DIM]
    stddev_p = slab[:, HIDDEN + LATENT_DIM:HIDDEN + 2 * LATENT_DIM]
    z = slab[:, HIDDEN + 2 * LATENT_DIM:HIDDEN + 3 * LATENT_DIM]
    xhat = slab[:, HIDDEN + 3 * LATENT_DIM:_OUT_COLS]
    return y, mean, stddev_p, z, xhat


# --------------------------------------------------------------------------
# Param init (nn.Linear-style) and pure-JAX reference for validation.
# --------------------------------------------------------------------------
def _init_linear(key, out_dim, in_dim):
    kw, kb = jax.random.split(key)
    bound = 1.0 / jnp.sqrt(jnp.float32(in_dim))
    w = jax.random.uniform(kw, (out_dim, in_dim), jnp.float32, -bound, bound)
    b = jax.random.uniform(kb, (out_dim,), jnp.float32, -bound, bound)
    return w, b


def make_params(key):
    keys = jax.random.split(key, 8)
    params = {}
    params["We1"], params["be1"] = _init_linear(keys[0], HIDDEN, IN_DIM)
    params["We2"], params["be2"] = _init_linear(keys[1], HIDDEN, HIDDEN)
    params["We3"], params["be3"] = _init_linear(keys[2], HIDDEN, HIDDEN)
    params["Wmu"], params["bmu"] = _init_linear(keys[3], LATENT_DIM, HIDDEN)
    params["Wstd"], params["bstd"] = _init_linear(keys[4], LATENT_DIM, HIDDEN)
    params["Wd1"], params["bd1"] = _init_linear(keys[5], HIDDEN, LATENT_DIM)
    params["Wd2"], params["bd2"] = _init_linear(keys[6], HIDDEN, HIDDEN)
    params["Wd3"], params["bd3"] = _init_linear(keys[7], IN_DIM, HIDDEN)
    return params


def _reference_forward(x, eps, params):
    def lin(h, w, b):
        return h @ params[w].T + params[b]
    y = jax.nn.relu(lin(x, "We1", "be1"))
    y = jax.nn.relu(lin(y, "We2", "be2"))
    y = jax.nn.relu(lin(y, "We3", "be3"))
    mean = lin(y, "Wmu", "bmu")
    stddev_p = lin(y, "Wstd", "bstd")
    z = eps * jnp.exp(stddev_p / 2.0) + mean
    xhat = jax.nn.relu(lin(z, "Wd1", "bd1"))
    xhat = jax.nn.relu(lin(xhat, "Wd2", "bd2"))
    xhat = jax.nn.sigmoid(lin(xhat, "Wd3", "bd3"))
    return y, mean, stddev_p, z, xhat


# TODO(synk): step()/backward/Adam (training) are out of scope for a forward
# kernel; torch.randn sampling is provided as the `eps` input (done in JAX).

if __name__ == "__main__":
    key = jax.random.PRNGKey(0)
    kx, keps, kparams = jax.random.split(key, 3)

    N = 8
    x = jax.random.normal(kx, (N, IN_DIM), jnp.float32)
    eps = jax.random.normal(keps, (N, LATENT_DIM), jnp.float32)
    params = make_params(kparams)
    packed = prepare_params(params)   # one-time packing, outside the hot path

    outs = vae_forward(x, eps, packed)
    outs = jax.block_until_ready(outs)

    refs = _reference_forward(x, eps, params)
    names = ("y", "mean", "stddev_p", "z", "xhat")
    for name, o, r in zip(names, outs, refs):
        assert o.shape == r.shape and o.dtype == r.dtype, name
        assert jnp.allclose(o, r, atol=1e-5, rtol=1e-5), f"mismatch in {name}"

    print("KERNEL_OK")
</pallas_src>

<mosaic_0001>
module attributes {stable_mosaic.version = 11 : i64} {
  func.func @_vae_kernel(%arg0: i32, %arg1: memref<8x2xf32, #tpu.memory_space<vmem>>, %arg2: memref<8x6xf32, #tpu.memory_space<vmem>>, %arg3: memref<3x50x50xf32, #tpu.memory_space<vmem>>, %arg4: memref<8x50xf32, #tpu.memory_space<vmem>>, %arg5: memref<50x14xf32, #tpu.memory_space<vmem>>, %arg6: memref<1x264xf32, #tpu.memory_space<vmem>>, %arg7: memref<8x128xf32, #tpu.memory_space<vmem>>) attributes {dimension_semantics = [#tpu.dimension_semantics<parallel>], iteration_bounds = array<i64: 1>, scalar_prefetch = 0 : i64, scratch_operands = 0 : i64, tpu.core_type = #tpu.core_type<tc>, window_params = [{transform_indices = @transform_0, window_bounds = array<i64: 8, 2>}, {transform_indices = @transform_1, window_bounds = array<i64: 8, 6>}, {pipeline_mode = #tpu.pipeline_mode<synchronous>, transform_indices = @transform_2, window_bounds = array<i64: 3, 50, 50>}, {pipeline_mode = #tpu.pipeline_mode<synchronous>, transform_indices = @transform_3, window_bounds = array<i64: 8, 50>}, {pipeline_mode = #tpu.pipeline_mode<synchronous>, transform_indices = @transform_4, window_bounds = array<i64: 50, 14>}, {pipeline_mode = #tpu.pipeline_mode<synchronous>, transform_indices = @transform_5, window_bounds = array<i64: 1, 264>}, {transform_indices = @transform_6, window_bounds = array<i64: 8, 128>}]} {
    %c0 = arith.constant 0 : index
    %c0_0 = arith.constant 0 : index
    %0 = vector.load %arg1[%c0, %c0_0] : memref<8x2xf32, #tpu.memory_space<vmem>>, vector<8x2xf32>
    %c0_1 = arith.constant 0 : index
    %c0_2 = arith.constant 0 : index
    %1 = vector.load %arg6[%c0_1, %c0_2] : memref<1x264xf32, #tpu.memory_space<vmem>>, vector<1x50xf32>
    %c0_3 = arith.constant 0 : index
    %c50 = arith.constant 50 : index
    %2 = vector.load %arg6[%c0_3, %c50] : memref<1x264xf32, #tpu.memory_space<vmem>>, vector<1x50xf32>
    %c0_4 = arith.constant 0 : index
    %c100 = arith.constant 100 : index
    %3 = vector.load %arg6[%c0_4, %c100] : memref<1x264xf32, #tpu.memory_space<vmem>>, vector<1x50xf32>
    %c0_5 = arith.constant 0 : index
    %c150 = arith.constant 150 : index
    %4 = vector.load %arg6[%c0_5, %c150] : memref<1x264xf32, #tpu.memory_space<vmem>>, vector<1x12xf32>
    %c0_6 = arith.constant 0 : index
    %c162 = arith.constant 162 : index
    %5 = vector.load %arg6[%c0_6, %c162] : memref<1x264xf32, #tpu.memory_space<vmem>>, vector<1x50xf32>
    %c0_7 = arith.constant 0 : index
    %c212 = arith.constant 212 : index
    %6 = vector.load %arg6[%c0_7, %c212] : memref<1x264xf32, #tpu.memory_space<vmem>>, vector<1x50xf32>
    %c0_8 = arith.constant 0 : index
    %c262 = arith.constant 262 : index
    %7 = vector.load %arg6[%c0_8, %c262] : memref<1x264xf32, #tpu.memory_space<vmem>>, vector<1x2xf32>
    %c0_9 = arith.constant 0 : index
    %c0_10 = arith.constant 0 : index
    %8 = vector.load %arg4[%c0_9, %c0_10] : memref<8x50xf32, #tpu.memory_space<vmem>>, vector<1x50xf32>
    %c1 = arith.constant 1 : index
    %c0_11 = arith.constant 0 : index
    %9 = vector.load %arg4[%c1, %c0_11] : memref<8x50xf32, #tpu.memory_space<vmem>>, vector<1x50xf32>
    %10 = vector.extract_strided_slice %0 {offsets = [0, 0], sizes = [8, 1], strides = [1, 1]} : vector<8x2xf32> to vector<8x1xf32>
    %11 = vector.broadcast %10 : vector<8x1xf32> to vector<8x50xf32>
    %12 = vector.broadcast %8 : vector<1x50xf32> to vector<8x50xf32>
    %13 = arith.mulf %11, %12 : vector<8x50xf32>
    %14 = vector.extract_strided_slice %0 {offsets = [0, 1], sizes = [8, 1], strides = [1, 1]} : vector<8x2xf32> to vector<8x1xf32>
    %15 = vector.broadcast %14 : vector<8x1xf32> to vector<8x50xf32>
    %16 = vector.broadcast %9 : vector<1x50xf32> to vector<8x50xf32>
    %17 = arith.mulf %15, %16 : vector<8x50xf32>
    %18 = arith.addf %13, %17 : vector<8x50xf32>
    %19 = vector.broadcast %1 : vector<1x50xf32> to vector<8x50xf32>
    %20 = arith.addf %18, %19 : vector<8x50xf32>
    %cst = arith.constant 0.000000e+00 : f32
    %21 = vector.broadcast %cst : f32 to vector<8x50xf32>
    %22 = arith.maximumf %20, %21 : vector<8x50xf32>
    %c0_12 = arith.constant 0 : index
    %c0_13 = arith.constant 0 : index
    %c0_14 = arith.constant 0 : index
    %23 = vector.load %arg3[%c0_12, %c0_13, %c0_14] : memref<3x50x50xf32, #tpu.memory_space<vmem>>, vector<1x50x50xf32>
    %24 = vector.shape_cast %23 : vector<1x50x50xf32> to vector<50x50xf32>
    %cst_15 = arith.constant dense<0.000000e+00> : vector<8x50xf32>
    %25 = tpu.matmul %22, %24, %cst_15 {dimension_numbers = #tpu.dot_dimension_numbers<[1], [0], [0], [1], [0, 0, 1, 1], [], []>} : vector<8x50xf32>, vector<50x50xf32>, vector<8x50xf32> -> vector<8x50xf32>
    %26 = vector.broadcast %2 : vector<1x50xf32> to vector<8x50xf32>
    %27 = arith.addf %25, %26 : vector<8x50xf32>
    %cst_16 = arith.constant 0.000000e+00 : f32
    %28 = vector.broadcast %cst_16 : f32 to vector<8x50xf32>
    %29 = arith.maximumf %27, %28 : vector<8x50xf32>
    %c1_17 = arith.constant 1 : index
    %c0_18 = arith.constant 0 : index
    %c0_19 = arith.constant 0 : index
    %30 = vector.load %arg3[%c1_17, %c0_18, %c0_19] : memref<3x50x50xf32, #tpu.memory_space<vmem>>, vector<1x50x50xf32>
    %31 = vector.shape_cast %30 : vector<1x50x50xf32> to vector<50x50xf32>
    %cst_20 = arith.constant dense<0.000000e+00> : vector<8x50xf32>
    %32 = tpu.matmul %29, %31, %cst_20 {dimension_numbers = #tpu.dot_dimension_numbers<[1], [0], [0], [1], [0, 0, 1, 1], [], []>} : vector<8x50xf32>, vector<50x50xf32>, vector<8x50xf32> -> vector<8x50xf32>
    %33 = vector.broadcast %3 : vector<1x50xf32> to vector<8x50xf32>
    %34 = arith.addf %32, %33 : vector<8x50xf32>
    %cst_21 = arith.constant 0.000000e+00 : f32
    %35 = vector.broadcast %cst_21 : f32 to vector<8x50xf32>
    %36 = arith.maximumf %34, %35 : vector<8x50xf32>
    %c0_22 = arith.constant 0 : index
    %c0_23 = arith.constant 0 : index
    %37 = vector.load %arg5[%c0_22, %c0_23] : memref<50x14xf32, #tpu.memory_space<vmem>>, vector<50x12xf32>
    %cst_24 = arith.constant dense<0.000000e+00> : vector<8x12xf32>
    %38 = tpu.matmul %36, %37, %cst_24 {dimension_numbers = #tpu.dot_dimension_numbers<[1], [0], [0], [1], [0, 0, 1, 1], [], []>} : vector<8x50xf32>, vector<50x12xf32>, vector<8x12xf32> -> vector<8x12xf32>
    %39 = vector.broadcast %4 : vector<1x12xf32> to vector<8x12xf32>
    %40 = arith.addf %38, %39 : vector<8x12xf32>
    %41 = vector.extract_strided_slice %40 {offsets = [0, 0], sizes = [8, 6], strides = [1, 1]} : vector<8x12xf32> to vector<8x6xf32>
    %42 = vector.extract_strided_slice %40 {offsets = [0, 6], sizes = [8, 6], strides = [1, 1]} : vector<8x12xf32> to vector<8x6xf32>
    %c0_25 = arith.constant 0 : index
    %c0_26 = arith.constant 0 : index
    %43 = vector.load %arg2[%c0_25, %c0_26] : memref<8x6xf32, #tpu.memory_space<vmem>>, vector<8x6xf32>
    %cst_27 = arith.constant 5.000000e-01 : f32
    %44 = vector.broadcast %cst_27 : f32 to vector<8x6xf32>
    %45 = arith.mulf %42, %44 : vector<8x6xf32>
    %46 = math.exp %45 : vector<8x6xf32>
    %47 = arith.mulf %43, %46 : vector<8x6xf32>
    %48 = arith.addf %47, %41 : vector<8x6xf32>
    %c2 = arith.constant 2 : index
    %c0_28 = arith.constant 0 : index
    %49 = vector.load %arg4[%c2, %c0_28] : memref<8x50xf32, #tpu.memory_space<vmem>>, vector<6x50xf32>
    %cst_29 = arith.constant dense<0.000000e+00> : vector<8x50xf32>
    %50 = tpu.matmul %48, %49, %cst_29 {dimension_numbers = #tpu.dot_dimension_numbers<[1], [0], [0], [1], [0, 0, 1, 1], [], []>} : vector<8x6xf32>, vector<6x50xf32>, vector<8x50xf32> -> vector<8x50xf32>
    %51 = vector.broadcast %5 : vector<1x50xf32> to vector<8x50xf32>
    %52 = arith.addf %50, %51 : vector<8x50xf32>
    %cst_30 = arith.constant 0.000000e+00 : f32
    %53 = vector.broadcast %cst_30 : f32 to vector<8x50xf32>
    %54 = arith.maximumf %52, %53 : vector<8x50xf32>
    %c2_31 = arith.constant 2 : index
    %c0_32 = arith.constant 0 : index
    %c0_33 = arith.constant 0 : index
    %55 = vector.load %arg3[%c2_31, %c0_32, %c0_33] : memref<3x50x50xf32, #tpu.memory_space<vmem>>, vector<1x50x50xf32>
    %56 = vector.shape_cast %55 : vector<1x50x50xf32> to vector<50x50xf32>
    %cst_34 = arith.constant dense<0.000000e+00> : vector<8x50xf32>
    %57 = tpu.matmul %54, %56, %cst_34 {dimension_numbers = #tpu.dot_dimension_numbers<[1], [0], [0], [1], [0, 0, 1, 1], [], []>} : vector<8x50xf32>, vector<50x50xf32>, vector<8x50xf32> -> vector<8x50xf32>
    %58 = vector.broadcast %6 : vector<1x50xf32> to vector<8x50xf32>
    %59 = arith.addf %57, %58 : vector<8x50xf32>
    %cst_35 = arith.constant 0.000000e+00 : f32
    %60 = vector.broadcast %cst_35 : f32 to vector<8x50xf32>
    %61 = arith.maximumf %59, %60 : vector<8x50xf32>
    %c0_36 = arith.constant 0 : index
    %c12 = arith.constant 12 : index
    %62 = vector.load %arg5[%c0_36, %c12] : memref<50x14xf32, #tpu.memory_space<vmem>>, vector<50x2xf32>
    %cst_37 = arith.constant dense<0.000000e+00> : vector<8x2xf32>
    %63 = tpu.matmul %61, %62, %cst_37 {dimension_numbers = #tpu.dot_dimension_numbers<[1], [0], [0], [1], [0, 0, 1, 1], [], []>} : vector<8x50xf32>, vector<50x2xf32>, vector<8x2xf32> -> vector<8x2xf32>
    %64 = vector.broadcast %7 : vector<1x2xf32> to vector<8x2xf32>
    %65 = arith.addf %63, %64 : vector<8x2xf32>
    %66 = arith.negf %65 : vector<8x2xf32>
    %67 = math.exp %66 : vector<8x2xf32>
    %cst_38 = arith.constant 1.000000e+00 : f32
    %68 = vector.broadcast %cst_38 : f32 to vector<8x2xf32>
    %69 = arith.addf %68, %67 : vector<8x2xf32>
    %70 = arith.divf %68, %69 : vector<8x2xf32>
    %cst_39 = arith.constant 0.000000e+00 : f32
    %71 = vector.broadcast %cst_39 : f32 to vector<8x58xf32>
    %72 = tpu.concatenate %36, %41, %42, %48, %70, %71 in 1 : vector<8x50xf32>, vector<8x6xf32>, vector<8x6xf32>, vector<8x6xf32>, vector<8x2xf32>, vector<8x58xf32> -> vector<8x128xf32>
    %c0_40 = arith.constant 0 : index
    %c0_41 = arith.constant 0 : index
    %73 = vector.load %arg7[%c0_40, %c0_41] : memref<8x128xf32, #tpu.memory_space<vmem>>, vector<8x128xf32>
    tpu.vector_store %arg7[%c0_40, %c0_41], %72 {strides = array<i32>} : memref<8x128xf32, #tpu.memory_space<vmem>>, vector<8x128xf32>,
    return
  }
  func.func @transform_0(%arg0: i32) -> (i32, i32) {
    %c0_i32 = arith.constant 0 : i32
    %c0_i32_0 = arith.constant 0 : i32
    return %arg0, %c0_i32 : i32, i32
  }
  func.func @transform_1(%arg0: i32) -> (i32, i32) {
    %c0_i32 = arith.constant 0 : i32
    %c0_i32_0 = arith.constant 0 : i32
    return %arg0, %c0_i32 : i32, i32
  }
  func.func @transform_2(%arg0: i32) -> (i32, i32, i32) {
    %c0_i32 = arith.constant 0 : i32
    %c0_i32_0 = arith.constant 0 : i32
    %c0_i32_1 = arith.constant 0 : i32
    %c0_i32_2 = arith.constant 0 : i32
    return %c0_i32, %c0_i32_0, %c0_i32_1 : i32, i32, i32
  }
  func.func @transform_3(%arg0: i32) -> (i32, i32) {
    %c0_i32 = arith.constant 0 : i32
    %c0_i32_0 = arith.constant 0 : i32
    %c0_i32_1 = arith.constant 0 : i32
    return %c0_i32, %c0_i32_0 : i32, i32
  }
  func.func @transform_4(%arg0: i32) -> (i32, i32) {
    %c0_i32 = arith.constant 0 : i32
    %c0_i32_0 = arith.constant 0 : i32
    %c0_i32_1 = arith.constant 0 : i32
    return %c0_i32, %c0_i32_0 : i32, i32
  }
  func.func @transform_5(%arg0: i32) -> (i32, i32) {
    %c0_i32 = arith.constant 0 : i32
    %c0_i32_0 = arith.constant 0 : i32
    %c0_i32_1 = arith.constant 0 : i32
    return %c0_i32, %c0_i32_0 : i32, i32
  }
  func.func @transform_6(%arg0: i32) -> (i32, i32) {
    %c0_i32 = arith.constant 0 : i32
    %c0_i32_0 = arith.constant 0 : i32
    return %arg0, %c0_i32 : i32, i32
  }
}

</mosaic_0001>

<bundles_post_ra>
// kernel: vae_forward.1
= control target key start
LH: loop header
LB: loop body
LE: loop exit
PB: predicated region body
PF: predicated region fallthrough
CT: control target
= control target key end

     0   :  { %11 = vsyncpa [#allocation3], 0  ;;  %s949_s21 = smov [#allocation2]   ;;  %s1141_s0 = inlined_call_operand.vmem [shape: f32[8,2], index: 0, kind: input, shape index: {}]   ;;  %s1142_s1 = inlined_call_operand.vmem [shape: f32[8,6], index: 1, kind: input, shape index: {}]   ;;  %s1143_s2 = inlined_call_operand.hbm [shape: f32[3,50,50], index: 2, kind: input, shape index: {}]   ;;  %s1144_s3 = inlined_call_operand.vmem [shape: f32[8,50], index: 3, kind: input, shape index: {}]   ;;  %s1145_s4 = inlined_call_operand.vmem [shape: f32[50,14], index: 4, kind: input, shape index: {}]   ;;  %s1146_s5 = inlined_call_operand.vmem [shape: f32[1,264], index: 5, kind: input, shape index: {}]   ;;  %s1147_s6 = inlined_call_operand.vmem [shape: f32[8,128], index: 6, kind: output, shape index: {}]  }
   0x1   :  { %s21_s22 = sshll.u32 %s949_s21, 4  ;;  %s925_s25 = scalar_lea.hbm %s1143_s2, 2688  ;;  %s22_s22 = int_to_ptr.vmem [resolvable:$true] %s21_s22 }
   0x2   :  { %p926_p0 = scmp.ne.s32.totalorder %s1143_s2, %s925_s25  ;;  %p929_p1 = scmp.lt.u32.totalorder %s925_s25, %s1143_s2 }
   0x4   :  { %p931_p2 = pnand %p929_p1, %p926_p0 }
   0x6   :  { %934 = shalt.err (!%p931_p2)
}
   0x7   :  { %s935_s30 = scalar_lea.vmem %s22_s22, 2688  ;;  %p940_p4 = scmp.lt.s32.totalorder %s22_s22, %s22_s22 }
   0x8   :  { %p936_p3 = scmp.ne.s32.totalorder %s22_s22, %s935_s30  ;;  %p941_p5 = scmp.lt.s32.totalorder %s935_s30, %s935_s30 }
   0xa   :  { %p942_p6 = por %p941_p5, %p940_p4 }
   0xc   :  { %p943_p7 = pnand %p942_p6, %p936_p3 }
   0xe   :  { %946 = shalt.err (!%p943_p7)
}
   0xf   :  { %s950_s7 = smov 128   ;;  %s951_s8 = smov 8  }
  0x10   :  { %27 = dma.hbm_to_vmem [thread:$0]  %s1143_s2, 2688, %s22_s22, [#allocation3], %s950_s7, %s950_s7, %s951_s8  }
  0x11   :  { %947 = dma.done.wait [#allocation3], 2688  }
  0x12   :  { %948 = vsyncadd [#allocation3], 4294964608  ;;  %v952_v0 = vmov 0   ;;  %v953_v1 = vmov 0.0|0.0   ;;  %v37_v2 = vld [vmem:[%s1141_s0] sm:$0xff]  ;;  %v73_v3 = vld [vmem:[#allocation2] sm:$0xff]  ;;  %v171_v35 = vlaneseq }
  0x13   :  { %902 = vset.pattern.permute.xlu0 %v952_v0  ;;  %839 = vmatprep.subr.bf16.mxu0 %v953_v1  ;;  %v74_v4 = vld [vmem:[#allocation2 + $0x8] sm:$0xff]  ;;  %v75_v5 = vld [vmem:[#allocation2 + $0x10] sm:$0xff]  ;;  %v76_v6 = vld [vmem:[#allocation2 + $0x18] sm:$0xff]  ;;  %v954_v9 = vmov 1   ;;  %v955_v14 = vmov 0.0   ;;  %vm87_vm0 = vcmask 1041408  }
  0x14   :  { %848 = vmatprep.subr.bf16.mxu1 %v953_v1  ;;  %47 = vperm.xlu0 %902, %v37_v2   ;;  %v840_v7 = vpack.c.bf16 %v74_v4, %v73_v3  ;;  %v843_v8 = vpack.c.bf16 %v76_v6, %v75_v5  ;;  %v77_v10 = vld [vmem:[#allocation2 + $0x20] sm:$0xff]  ;;  %v78_v11 = vld [vmem:[#allocation2 + $0x28] sm:$0xff]  ;;  %v691_v13 = vld [vmem:[%s1146_s5] ss:$0 sm:$0xff]  ;;  %vm956_vm1 = vmmov 0   ;;  %s957_s13 = smov 78  }
  0x15   :  { %v846_v12 = vpack.c.bf16 %v78_v11, %v77_v10  ;;  %v79_v15 = vld [vmem:[#allocation2 + $0x30] sm:$0x3]  ;;  %763 = vmatprep.mubr.msk.f32.mxu0 %vm956_vm1, %v955_v14  ;;  %v163_v16 = vld [vmem:[#allocation2 + $0x38] sm:$0xff]  ;;  %v164_v17 = vld [vmem:[#allocation2 + $0x40] sm:$0xff]  ;;  %780 = vmatprep.mubr.msk.f32.mxu1 %vm956_vm1, %v955_v14  ;;  %vm83_vm2 = vcmask 408576   ;;  %v1063_v41 = vshrl.u32 %v171_v35, 7 }
  0x16   :  { %841 = vmatpush3.bf16.msra.mxu0 %v840_v7  ;;  %v165_v18 = vld [vmem:[#allocation2 + $0x48] sm:$0xff]  ;;  %80 = vrot.lane.b32.xlu1 %v691_v13, %s957_s13  ;;  %v849_v19 = vpack.c.bf16 %v164_v17, %v163_v16  ;;  %v166_v20 = vld [vmem:[#allocation2 + $0x50] sm:$0xff]  ;;  %v167_v22 = vld [vmem:[#allocation2 + $0x58] sm:$0xff]  ;;  %s958_s28 = smov 28   ;;  %s959_s0 = smov 106   ;;  %vm183_vm3 = vcmask 228352  }
  0x17   :  { %842 = vmatprep.subr.bf16.mxu0 %v953_v1  ;;  %v852_v21 = vpack.c.bf16 %v166_v20, %v165_v18  ;;  %v168_v23 = vld [vmem:[#allocation2 + $0x60] sm:$0xff]  ;;  %v689_v26 = vld [vmem:[%s1144_s3] ss:$0 sm:$0xff]  ;;  %v690_v27 = vld [vmem:[%s1144_s3 + $0x1] ss:$0 sm:$0xff]  ;;  %v173_v44 = vsub.s32 0, %v1063_v41 }
  0x18   :  { %903 = vset.pattern.permute.xlu0 %v954_v9  ;;  %850 = vmatpush3.bf16.msra.mxu1 %v849_v19  ;;  %v855_v24 = vpack.c.bf16 %v168_v23, %v167_v22  ;;  %v169_v34 = vld [vmem:[#allocation2 + $0x68] sm:$0x3]  ;;  %v1047_v36 = vld [vmem:[%s1145_s4] sm:$0xff]  ;;  %v1052_v37 = vld [vmem:[%s1145_s4 + $0x8] sm:$0xff]  ;;  %v177_v45 = vsub.s32 1, %v1063_v41  ;;  %s960_s2 = smov 94  }
  0x19   :  { %56 = vperm.xlu0 %903, %v37_v2   ;;  %851 = vmatprep.subr.bf16.mxu1 %v953_v1  ;;  %v858_v38 = vpack.c.bf16 %v1052_v37, %v1047_v36  ;;  %v265_v39 = vld [vmem:[%s1145_s4 + $0x10] sm:$0xff]  ;;  %v266_v40 = vld [vmem:[%s1145_s4 + $0x18] sm:$0xff]  ;;  %v39_v42 = vld [vmem:[%s1146_s5] sm:$0x3]  ;;  %s961_s15 = smov 116   ;;  %s963_s16 = smov 50  }
  0x1a   :  { %844 = vmatpush3.bf16.msra.mxu0 %v843_v8  ;;  %v861_v43 = vpack.c.bf16 %v266_v40, %v265_v39  ;;  %v174_v46 = vrot.slane %v39_v42, %v173_v44  ;;  %v178_v47 = vrot.slane %v39_v42, %v177_v45  ;;  %v267_v53 = vld [vmem:[%s1145_s4 + $0x20] sm:$0xff]  ;;  %v268_v54 = vld [vmem:[%s1145_s4 + $0x28] sm:$0xff]  ;;  %v269_v56 = vld [vmem:[%s1145_s4 + $0x30] sm:$0x3]  ;;  %v909_v58 = vpack.i.bf16 %v266_v40, %v265_v39  ;;  %s962_s4 = smov 44   ;;  %s964_s19 = smov 122  }
  0x1b   :  { %845 = vmatprep.subr.bf16.mxu0 %v953_v1  ;;  %v864_v55 = vpack.c.bf16 %v268_v54, %v267_v53  ;;  %v696_v57 = vld [vmem:[%s1146_s5 + $0x1] ss:$0 sm:$0xff]  ;;  %v364_v11 = vld [vmem:[%s1144_s3 + $0x2] sm:$0x3f]  ;;  %vm372_vm4 = vcmask 1045504   ;;  %vm368_vm5 = vcmask 48128  }
  0x1c   :  { %853 = vmatpush3.bf16.msra.mxu1 %v852_v21  ;;  %179 = vrot.lane.b32.xlu1 %v174_v46, %s958_s28  ;;  %v41_v59 = vld [vmem:[%s1146_s5 + $0x1] sm:$0x3]  ;;  %v449_v21 = vld [vmem:[#allocation2 + $0x78] sm:$0xff]  ;;  %v454_v46 = vld [vmem:[#allocation2 + $0xa0] sm:$0x3]  ;;  %vm468_vm6 = vcmask 359424  }
  0x1d   :  { %854 = vmatprep.subr.bf16.mxu1 %v953_v1  ;;  %275 = vrot.lane.b32.xlu0 %v696_v57, %s959_s0  ;;  %v459_v60 = vrot.slane %v41_v59, %v173_v44  ;;  %v463_v16 = vrot.slane %v41_v59, %v177_v45  ;;  %v703_v17 = vld [vmem:[%s1146_s5 + $0x2] ss:$0 sm:$0xff]  ;;  %s965_s5 = smov 62   ;;  %v453_v44 = vld [vmem:[#allocation2 + $0x98] sm:$0xff]  ;;  %vm675_vm7 = vcmask 457728   ;;  %vm677_vm8 = vcmask 506880  }
  0x1e   :  { %847 = vmatpush3.bf16.msra.mxu0 %v846_v12  ;;  %v354_v19 = vld [vmem:[%s1142_s1] sm:$0xff]  ;;  %s966_s1 = smov 68   ;;  %vm679_vm9 = vcmask 556032   ;;  %vm681_vm10 = vcmask 572416  }
  0x1f   :  { %761 = vmatprep.subr.mxu0 %v955_v14  ;;  %v448_v20 = vld [vmem:[#allocation2 + $0x70] sm:$0xff] }
  0x20   :  { %856 = vmatpush3.bf16.msra.mxu1 %v855_v24  ;;  %181 = vrot.lane.b32.xlu1 %v178_v47, %s958_s28  ;;  %v867_v24 = vpack.c.bf16 %v449_v21, %v448_v20 }
  0x21   :  { %778 = vmatprep.subr.mxu1 %v955_v14  ;;  %365 = vrot.lane.b32.xlu0 %v696_v57, %s960_s2 }
  0x22   :  { %762 = vmatpush3.msk.msra.mxu0 %vm87_vm0, %v79_v15  ;;  %v914_v15 = vpack.i.bf16 %v268_v54, %v267_v53 }
  0x23   :  { %857 = vmatprep.subr.bf16.mxu0 %v953_v1 }
  0x24   :  { %779 = vmatpush3.msk.msra.mxu1 %vm87_vm0, %v169_v34 }
  0x25   :  { %800 = vmatprep.subr.mxu1 %v955_v14  ;;  %910 = vrot.lane.b32.xlu0 %v909_v58, %s961_s15 }
  0x29   :  { %464 = vrot.lane.b32.xlu0 %v459_v60, %s962_s4 }
  0x2d   :  { %571 = vrot.lane.b32.xlu0 %v269_v56, %s961_s15 }
  0x88   :  { %v81_v48 = vpop.permute.xlu1 %80 }
  0x8e   :  { %v180_v61 = vpop.permute.xlu1 %179 }
  0x92   :  { %v182_v62 = vpop.permute.xlu1 %181 }
  0x93   :  { %v48_v25 = vpop.permute.xlu0 %47  ;;  %v184_v63 = vsel %vm183_vm3, %v180_v61, %v182_v62 }
  0x94   :  { %v54_v29 = vmul.f32 %v689_v26, %v48_v25  ;;  %v450_v26 = vld [vmem:[#allocation2 + $0x80] sm:$0xff] }
  0x98   :  { %v57_v28 = vpop.permute.xlu0 %56 }
  0x99   :  { %v63_v30 = vmul.f32 %v690_v27, %v57_v28  ;;  %v451_v27 = vld [vmem:[#allocation2 + $0x88] sm:$0xff] }
  0x9a   :  { %v870_v34 = vpack.c.bf16 %v451_v27, %v450_v26 }
  0x9b   :  { %v64_v31 = vadd.f32 %v63_v30, %v54_v29 }
  0x9c   :  { %v276_v5 = vpop.permute.xlu0 %275 }
  0x9d   :  { %v71_v32 = vadd.f32 %v691_v13, %v64_v31  ;;  %v904_v13 = vpack.i.bf16 %v1052_v37, %v1047_v36 }
  0x9f   :  { %v72_v33 = vmax.f32 %v71_v32, 0.0 }
  0xa0   :  { %v366_v18 = vpop.permute.xlu0 %365 }
  0xa1   :  { %764 = vmatmul.mubr.msk.f32.vlgmr.msra.gmra.mrb[0].mxu0 %vm83_vm2, %v72_v33 }
  0xa2   :  { %797 = vmatprep.mubr.msk.f32.mxu0 %vm956_vm1, %v955_v14  ;;  %859 = vmatpush3.bf16.msra.mxu0 %v858_v38 }
  0xa3   :  { %860 = vmatprep.subr.bf16.mxu0 %v953_v1 }
  0xa4   :  { %v911_v28 = vpop.permute.xlu0 %910 }
  0xa5   :  { %v913_v30 = vunpack.i.h.bf16 %v911_v28  ;;  %v912_v31 = vunpack.i.l.bf16 %v911_v28 }
  0xa6   :  { %862 = vmatpush3.bf16.msra.mxu0 %v861_v43  ;;  %v452_v43 = vld [vmem:[#allocation2 + $0x90] sm:$0xff] }
  0xa7   :  { %863 = vmatprep.subr.bf16.mxu0 %v953_v1  ;;  %v879_v37 = vpack.c.bf16 %v913_v30, %v912_v31  ;;  %v873_v45 = vpack.c.bf16 %v453_v44, %v452_v43 }
  0xa8   :  { %v465_v41 = vpop.permute.xlu0 %464 }
  0xaa   :  { %865 = vmatpush3.bf16.msra.mxu0 %v864_v55 }
  0xab   :  { %795 = vmatprep.subr.mxu0 %v955_v14 }
  0xac   :  { %v572_v42 = vpop.permute.xlu0 %571 }
  0xae   :  { %796 = vmatpush3.msk.msra.mxu0 %vm87_vm0, %v269_v56 }
  0xaf   :  { %875 = vmatprep.subr.bf16.mxu0 %v953_v1 }
 0x174   :  { %v157_v49 = vpop.f32.mrb[0].mxu0 }
 0x175   :  { %v158_v50 = vadd.f32 %v157_v49, %v81_v48  ;;  %v765_v51 = vpop.f32.mrb[1].mxu0 }
 0x177   :  { %v161_v52 = vmax.f32 %v158_v50, 0.0 }
 0x179   :  { %781 = vmatmul.mubr.msk.f32.vlgmr.msra.gmra.mrb[0].mxu1 %vm83_vm2, %v161_v52 }
 0x17a   :  { %802 = vmatprep.mubr.msk.f32.mxu1 %vm956_vm1, %v955_v14  ;;  %801 = vmatpush3.msk.msra.mxu1 %vm372_vm4, %v364_v11 }
 0x17b   :  { %866 = vmatprep.subr.bf16.mxu1 %v953_v1 }
 0x24c   :  { %v258_v0 = vpop.f32.mrb[0].mxu1 }
 0x24d   :  { %v1098_v2 = vadd.f32 %v258_v0, %v184_v63  ;;  %v782_v3 = vpop.f32.mrb[1].mxu1 }
 0x24f   :  { %v262_v4 = vmax.f32 %v1098_v2, 0.0 }
 0x251   :  { %798 = vmatmul.mubr.msk.f32.vlgmr.msra.gmra.mrb[2].mxu0 %vm83_vm2, %v262_v4 }
 0x252   :  { %836 = vmatprep.mubr.msk.f32.mxu0 %vm956_vm1, %v955_v14 }
 0x324   :  { %v350_v6 = vpop.f32.mrb[2].mxu0 }
 0x325   :  { %v351_v7 = vadd.f32 %v350_v6, %v276_v5  ;;  %v799_v8 = vpop.f32.mrb[3].mxu0 }
 0x327   :  { %v355_v9 = vmul.f32 0.5, %v351_v7  ;;  %664 = vrot.lane.b32.xlu0 %v351_v7, %s963_s16 }
 0x329   :  { %v356_v10 = vmul.f32 1.442695, %v355_v9 }
 0x32b   :  { %919 = vpow2.f32 %v356_v10 }
 0x335   :  { %v920_v12 = vpop.eup %919 }
 0x336   :  { %359 = vrot.lane.b32.xlu1 %v920_v12, %s964_s19 }
 0x33a   :  { %905 = vrot.lane.b32.xlu1 %v904_v13, %s961_s15 }
 0x33e   :  { %915 = vrot.lane.b32.xlu1 %v914_v15, %s961_s15 }
 0x342   :  { %466 = vrot.lane.b32.xlu1 %v463_v16, %s962_s4 }
 0x346   :  { %579 = vrot.lane.b32.xlu1 %v703_v17, %s964_s19 }
 0x399   :  { %v665_v63 = vpop.permute.xlu0 %664 }
 0x39a   :  { %v674_v0 = vsel %vm83_vm2, %v262_v4, %v665_v63 }
 0x39b   :  { %v676_v5 = vsel %vm675_vm7, %v674_v0, %v665_v63 }
 0x3a8   :  { %v360_v22 = vpop.permute.xlu1 %359 }
 0x3a9   :  { %v362_v23 = vmul.f32 %v360_v22, %v354_v19 }
 0x3ab   :  { %v363_v25 = vadd.f32 %v362_v23, %v351_v7 }
 0x3ac   :  { %v906_v29 = vpop.permute.xlu1 %905 }
 0x3ad   :  { %667 = vrot.lane.b32.xlu1 %v363_v25, %s965_s5  ;;  %803 = vmatmul.mubr.msk.f32.vlgmr.msra.gmra.mrb[2].mxu1 %vm368_vm5, %v363_v25  ;;  %v908_v32 = vunpack.i.h.bf16 %v906_v29  ;;  %v907_v33 = vunpack.i.l.bf16 %v906_v29 }
 0x3ae   :  { %868 = vmatpush3.bf16.msra.mxu1 %v867_v24  ;;  %819 = vmatprep.mubr.msk.f32.mxu1 %vm956_vm1, %v955_v14 }
 0x3af   :  { %v876_v35 = vpack.c.bf16 %v908_v32, %v907_v33  ;;  %869 = vmatprep.subr.bf16.mxu1 %v953_v1 }
 0x3b0   :  { %v916_v36 = vpop.permute.xlu1 %915 }
 0x3b1   :  { %v918_v38 = vunpack.i.h.bf16 %v916_v36  ;;  %v917_v39 = vunpack.i.l.bf16 %v916_v36  ;;  %877 = vmatpush3.bf16.msra.mxu0 %v876_v35 }
 0x3b2   :  { %871 = vmatpush3.bf16.msra.mxu1 %v870_v34  ;;  %878 = vmatprep.subr.bf16.mxu0 %v953_v1 }
 0x3b3   :  { %872 = vmatprep.subr.bf16.mxu1 %v953_v1  ;;  %v882_v40 = vpack.c.bf16 %v918_v38, %v917_v39 }
 0x3b5   :  { %880 = vmatpush3.bf16.msra.mxu0 %v879_v37 }
 0x3b6   :  { %881 = vmatprep.subr.bf16.mxu0 %v953_v1  ;;  %874 = vmatpush3.bf16.msra.mxu1 %v873_v45  ;;  %v467_v1 = vpop.permute.xlu1 %466 }
 0x3b7   :  { %817 = vmatprep.subr.mxu1 %v955_v14  ;;  %v469_v51 = vsel %vm468_vm6, %v465_v41, %v467_v1 }
 0x3b9   :  { %883 = vmatpush3.bf16.msra.mxu0 %v882_v40 }
 0x3ba   :  { %834 = vmatprep.subr.mxu0 %v955_v14  ;;  %818 = vmatpush3.msk.msra.mxu1 %vm87_vm0, %v454_v46  ;;  %v580_v56 = vpop.permute.xlu1 %579 }
 0x3bd   :  { %835 = vmatpush3.msk.msra.mxu0 %vm87_vm0, %v572_v42 }
 0x41f   :  { %v668_v3 = vpop.permute.xlu1 %667 }
 0x420   :  { %v678_v6 = vsel %vm677_vm8, %v676_v5, %v668_v3 }
 0x480   :  { %v442_v47 = vpop.f32.mrb[2].mxu1 }
 0x481   :  { %v443_v48 = vadd.f32 %v442_v47, %v366_v18  ;;  %v804_v49 = vpop.f32.mrb[3].mxu1 }
 0x483   :  { %v446_v50 = vmax.f32 %v443_v48, 0.0 }
 0x485   :  { %820 = vmatmul.mubr.msk.f32.vlgmr.msra.gmra.mrb[4].mxu1 %vm83_vm2, %v446_v50 }
 0x558   :  { %v543_v52 = vpop.f32.mrb[4].mxu1 }
 0x559   :  { %v544_v53 = vadd.f32 %v543_v52, %v469_v51  ;;  %v821_v54 = vpop.f32.mrb[5].mxu1 }
 0x55b   :  { %v547_v55 = vmax.f32 %v544_v53, 0.0 }
 0x55d   :  { %837 = vmatmul.mubr.msk.f32.vlgmr.msra.gmra.mrb[4].mxu0 %vm83_vm2, %v547_v55 }
 0x630   :  { %v653_v14 = vpop.f32.mrb[4].mxu0 }
 0x631   :  { %v654_v57 = vadd.f32 %v653_v14, %v580_v56  ;;  %v838_v58 = vpop.f32.mrb[5].mxu0 }
 0x633   :  { %v706_v59 = vmul.f32 -1.442695, %v654_v57 }
 0x635   :  { %921 = vpow2.f32 %v706_v59 }
 0x63f   :  { %v922_v60 = vpop.eup %921 }
 0x640   :  { %v660_v61 = vadd.f32 1.0, %v922_v60 }
 0x642   :  { %923 = vrcp.f32 %v660_v61 }
 0x64c   :  { %v924_v62 = vpop.eup %923 }
 0x64d   :  { %671 = vrot.lane.b32.xlu0 %v924_v62, %s966_s1 }
 0x6bf   :  { %v672_v7 = vpop.permute.xlu0 %671 }
 0x6c0   :  { %v680_v8 = vsel %vm679_vm9, %v678_v6, %v672_v7 }
 0x6c1   :  { %v682_v9 = vsel %vm681_vm10, %v680_v8, 0.0 }
 0x6c2   :  { %683 = vst [vmem:[%s1147_s6] sm:$0xff] %v682_v9 }
 0x6c3   :  { %688 = vsyncpa [#allocation3], 1 }

</bundles_post_ra>
